<compile_context>
chip_gen: v7x
topology: tpu7x:2x2x1
jax: 0.10.0
libtpu: 0.0.40
codegen_flags: <defaults>
</compile_context>

<pallas_src>
import functools

import jax
import jax.numpy as jnp
from jax.experimental import pallas as pl
from jax.experimental.pallas import tpu as pltpu


# ---------------------------------------------------------------------------
# Pass 1: fused QKV projection.  qkv = x @ W_qkv  (softmax scale folded into
# W_q on the host).  Weights are bf16 and VMEM-resident (constant index map).
# ---------------------------------------------------------------------------
def _qkv_proj_kernel(x_ref, w_ref, q_ref, k_ref, v_ref, *, inner):
    x = x_ref[0].astype(jnp.bfloat16)                                   # (bn, D)
    qkv = jnp.dot(x, w_ref[...], preferred_element_type=jnp.float32)    # (bn, 3*inner)
    q_ref[0] = qkv[:, :inner].astype(jnp.bfloat16)
    k_ref[0] = qkv[:, inner:2 * inner].astype(jnp.bfloat16)
    v_ref[0] = qkv[:, 2 * inner:].astype(jnp.bfloat16)


# ---------------------------------------------------------------------------
# Pass 2: attention + output projection + bias + residual.
# Grid = (batch, query_tile).  K/V block index is constant across the query
# axis (fetched once per batch); W_out / bias are VMEM-resident.
# ---------------------------------------------------------------------------
def _atten_kernel(x_ref, q_ref, k_ref, v_ref, wo_ref, bo_ref, o_ref, out_sc,
                  *, heads, dim_head):
    xq = x_ref[0]                                                        # (TQ, D) f32 residual

    # TODO(synk): for very large `heads` switch this static unroll to a
    # head-group grid axis / fori_loop to bound live ranges.
    for h in range(heads):
        lo = h * dim_head
        q_h = q_ref[0, :, lo:lo + dim_head]                              # (TQ, dh) bf16 (pre-scaled)
        k_h = k_ref[0, :, lo:lo + dim_head]                              # (N,  dh) bf16
        v_h = v_ref[0, :, lo:lo + dim_head]                              # (N,  dh) bf16

        # Scores: contract last dims directly (no explicit transpose).
        s = jax.lax.dot_general(q_h, k_h,
                                dimension_numbers=(((1,), (1,)), ((), ())),
                                preferred_element_type=jnp.float32)      # (TQ, N) f32

        # Numerically-stable softmax: f32 max/sum, bf16 exp (EUP), deferred norm.
        m = jnp.max(s, axis=-1, keepdims=True)                           # (TQ, 1) f32
        e = jnp.exp((s - m).astype(jnp.bfloat16))                        # (TQ, N) bf16
        l = jnp.sum(e, axis=-1, keepdims=True, dtype=jnp.float32)        # (TQ, 1) f32

        pv = jnp.dot(e, v_h, preferred_element_type=jnp.float32)         # (TQ, dh) f32
        pv = pv * pl.reciprocal(l, approx=True)                          # deferred softmax norm

        # Pack this head's output so the out-projection is ONE full-contraction
        # matmul instead of per-head (dh-deep) matmuls.
        out_sc[:, lo:lo + dim_head] = pv.astype(jnp.bfloat16)

    y = jnp.dot(out_sc[...], wo_ref[...], preferred_element_type=jnp.float32)  # (TQ, D)
    o_ref[0] = (xq + y + bo_ref[...]).astype(o_ref.dtype)                # residual + bias


# ---------------------------------------------------------------------------
# VMEM sizing helpers (generation aware).
# ---------------------------------------------------------------------------
def _vmem_limit_bytes():
    try:
        cap = int(pltpu.get_tpu_info().vmem_capacity_bytes)
    except Exception:
        cap = 64 * 1024 * 1024          # conservative: v7x has 64 MiB / TC
    return int(max(32 * 1024 * 1024, min(cap * 3 // 4, 100 * 1024 * 1024)))


def _pick_block_q(B, N, D, inner, vmem_limit):
    candidates = sorted({c for c in (1024, 512, 256, 128) if c < N and N % c == 0} | {N},
                        reverse=True)
    budget = int(vmem_limit * 0.85)
    # resident-ish cost: K+V blocks (double-buffered bf16) + W_out + bias
    resident = 2 * 2 * N * inner * 2 + 2 * inner * D * 2 + 2 * D * 4
    chosen = candidates[-1]
    for bq in candidates:
        per_tile = (2 * bq * inner * 2      # Q tile (bf16, double buffered)
                    + 2 * bq * D * 4        # x tile (f32)
                    + 2 * bq * D * 4        # out tile (f32)
                    + bq * inner * 2        # concat-heads scratch (bf16)
                    + 3 * bq * N * 4)       # score/exp temporaries margin
        if resident + per_tile <= budget:
            chosen = bq
            break
    # v7x megacore: give both TensorCores parallel grid work when possible.
    if B * (N // chosen) < 2 and chosen % 2 == 0 and (chosen // 2) % 8 == 0:
        chosen //= 2
    return chosen


# ---------------------------------------------------------------------------
# Wrapper: AttenLayer.forward (eval mode):  y = x + Attention(x)
# ---------------------------------------------------------------------------
def atten_layer(x, w_qkv, w_out, b_out, *, heads, dim_head, block_q=None):
    """x: (B, N, D) f32. w_qkv: (D, 3*heads*dim_head) (= torch W.T).
    w_out: (inner, D) (= torch W.T). b_out: (1, D)."""
    B, N, D = x.shape
    inner = heads * dim_head
    assert w_qkv.shape == (D, 3 * inner)
    scale = dim_head ** (-0.5)

    project_out = not (heads == 1 and dim_head == D)
    if project_out:
        assert w_out.shape == (inner, D)
        w_out_p = w_out
        b_out_p = jnp.asarray(b_out, jnp.float32).reshape(1, D)
    else:
        # torch uses nn.Identity() for to_out in this configuration.
        w_out_p = jnp.eye(inner, D, dtype=jnp.float32)
        b_out_p = jnp.zeros((1, D), jnp.float32)

    # ---- host-side parameter prep (once) ----------------------------------
    w_q, w_k, w_v = jnp.split(w_qkv, 3, axis=-1)
    w_q = w_q * scale                                     # fold softmax scale into W_q
    w_qkv_b = jnp.concatenate([w_q, w_k, w_v], axis=-1).astype(jnp.bfloat16)
    w_out_b = w_out_p.astype(jnp.bfloat16)

    vmem_limit = _vmem_limit_bytes()
    if block_q is None:
        block_q = _pick_block_q(B, N, D, inner, vmem_limit)
    assert N % block_q == 0

    common_params = pltpu.CompilerParams(
        dimension_semantics=("parallel", "parallel"),
        vmem_limit_bytes=vmem_limit,
    )

    # ---- pass 1: QKV projection -------------------------------------------
    q_p, k_p, v_p = pl.pallas_call(
        functools.partial(_qkv_proj_kernel, inner=inner),
        out_shape=(jax.ShapeDtypeStruct((B, N, inner), jnp.bfloat16),) * 3,
        grid_spec=pltpu.PrefetchScalarGridSpec(
            num_scalar_prefetch=0,
            grid=(B, N // block_q),
            in_specs=[
                pl.BlockSpec((1, block_q, D), lambda b, n: (b, n, 0)),     # x tile
                pl.BlockSpec((D, 3 * inner), lambda b, n: (0, 0)),         # W_qkv (resident)
            ],
            out_specs=[pl.BlockSpec((1, block_q, inner), lambda b, n: (b, n, 0))] * 3,
        ),
        compiler_params=common_params,
    )(x, w_qkv_b)

    # ---- pass 2: attention + out projection + residual ---------------------
    out = pl.pallas_call(
        functools.partial(_atten_kernel, heads=heads, dim_head=dim_head),
        out_shape=jax.ShapeDtypeStruct((B, N, D), x.dtype),
        grid_spec=pltpu.PrefetchScalarGridSpec(
            num_scalar_prefetch=0,
            grid=(B, N // block_q),
            in_specs=[
                pl.BlockSpec((1, block_q, D), lambda b, n: (b, n, 0)),      # x (residual)
                pl.BlockSpec((1, block_q, inner), lambda b, n: (b, n, 0)),  # Q tile (bf16)
                pl.BlockSpec((1, N, inner), lambda b, n: (b, 0, 0)),        # K (once per batch)
                pl.BlockSpec((1, N, inner), lambda b, n: (b, 0, 0)),        # V (once per batch)
                pl.BlockSpec((inner, D), lambda b, n: (0, 0)),              # W_out (resident)
                pl.BlockSpec((1, D), lambda b, n: (0, 0)),                  # bias (resident)
            ],
            out_specs=pl.BlockSpec((1, block_q, D), lambda b, n: (b, n, 0)),
            scratch_shapes=[pltpu.VMEM((block_q, inner), jnp.bfloat16)],
        ),
        compiler_params=common_params,
    )(x, q_p, k_p, v_p, w_out_b, b_out_p)
    return out


# ---------------------------------------------------------------------------
# Plain-JAX f32 reference of AttenLayer.forward (eval mode).
# ---------------------------------------------------------------------------
def reference(x, w_qkv, w_out, b_out, *, heads, dim_head):
    B, N, D = x.shape
    inner = heads * dim_head
    scale = dim_head ** (-0.5)
    qkv = x @ w_qkv
    q, k, v = jnp.split(qkv, 3, axis=-1)

    def to_heads(t):   # 'b n (h d) -> b h n d'
        return t.reshape(B, N, heads, dim_head).transpose(0, 2, 1, 3)

    q, k, v = map(to_heads, (q, k, v))
    dots = jnp.einsum('bhqd,bhkd->bhqk', q, k) * scale
    attn = jax.nn.softmax(dots, axis=-1)
    out = jnp.einsum('bhqk,bhkd->bhqd', attn, v)
    out = out.transpose(0, 2, 1, 3).reshape(B, N, inner)
    return x + (out @ w_out + b_out)


if __name__ == "__main__":
    # Small shapes consistent with the module: (batch, seq, dim).
    B, N, D = 2, 8, 32
    heads, dim_head = 2, 16
    inner = heads * dim_head

    key = jax.random.PRNGKey(0)
    k_x, k_qkv, k_out, k_b = jax.random.split(key, 4)

    x = jax.random.normal(k_x, (B, N, D), dtype=jnp.float32)
    # Parameters stored as (in_features, out_features) = torch W.T
    w_qkv = jax.random.normal(k_qkv, (D, 3 * inner), dtype=jnp.float32) * (D ** -0.5)
    w_out = jax.random.normal(k_out, (inner, D), dtype=jnp.float32) * (inner ** -0.5)
    b_out = jax.random.normal(k_b, (1, D), dtype=jnp.float32) * 0.02

    y = atten_layer(x, w_qkv, w_out, b_out, heads=heads, dim_head=dim_head)
    y = jax.block_until_ready(y)

    y_ref = reference(x, w_qkv, w_out, b_out, heads=heads, dim_head=dim_head)
    assert y.shape == (B, N, D)
    # bf16 Q/K/V + bf16 exp + approx reciprocal -> looser tolerance than pure f32.
    assert jnp.allclose(y, y_ref, atol=5e-2, rtol=5e-2), "mismatch vs reference"

    print("KERNEL_OK")
</pallas_src>

<mosaic_0001>
module attributes {stable_mosaic.version = 11 : i64} {
  func.func @_qkv_proj_kernel(%arg0: i32, %arg1: i32, %arg2: memref<1x8x32xf32, #tpu.memory_space<vmem>>, %arg3: memref<32x96xbf16, #tpu.memory_space<vmem>>, %arg4: memref<1x8x32xbf16, #tpu.memory_space<vmem>>, %arg5: memref<1x8x32xbf16, #tpu.memory_space<vmem>>, %arg6: memref<1x8x32xbf16, #tpu.memory_space<vmem>>) attributes {dimension_semantics = [#tpu.dimension_semantics<parallel>, #tpu.dimension_semantics<parallel>], iteration_bounds = array<i64: 2, 1>, scalar_prefetch = 0 : i64, scratch_operands = 0 : i64, tpu.core_type = #tpu.core_type<tc>, window_params = [{transform_indices = @transform_0, window_bounds = array<i64: 1, 8, 32>}, {pipeline_mode = #tpu.pipeline_mode<synchronous>, transform_indices = @transform_1, window_bounds = array<i64: 32, 96>}, {transform_indices = @transform_2, window_bounds = array<i64: 1, 8, 32>}, {transform_indices = @transform_3, window_bounds = array<i64: 1, 8, 32>}, {transform_indices = @transform_4, window_bounds = array<i64: 1, 8, 32>}]} {
    %c0 = arith.constant 0 : index
    %c0_0 = arith.constant 0 : index
    %c0_1 = arith.constant 0 : index
    %0 = vector.load %arg2[%c0, %c0_0, %c0_1] : memref<1x8x32xf32, #tpu.memory_space<vmem>>, vector<1x8x32xf32>
    %1 = vector.shape_cast %0 : vector<1x8x32xf32> to vector<8x32xf32>
    %2 = arith.truncf %1 : vector<8x32xf32> to vector<8x32xbf16>
    %c0_2 = arith.constant 0 : index
    %c0_3 = arith.constant 0 : index
    %3 = vector.load %arg3[%c0_2, %c0_3] : memref<32x96xbf16, #tpu.memory_space<vmem>>, vector<32x96xbf16>
    %cst = arith.constant dense<0.000000e+00> : vector<8x96xf32>
    %4 = tpu.matmul %2, %3, %cst {dimension_numbers = #tpu.dot_dimension_numbers<[1], [0], [0], [1], [0, 0, 1, 1], [], []>} : vector<8x32xbf16>, vector<32x96xbf16>, vector<8x96xf32> -> vector<8x96xf32>
    %5 = vector.extract_strided_slice %4 {offsets = [0, 0], sizes = [8, 32], strides = [1, 1]} : vector<8x96xf32> to vector<8x32xf32>
    %6 = arith.truncf %5 : vector<8x32xf32> to vector<8x32xbf16>
    %c0_4 = arith.constant 0 : index
    %c0_5 = arith.constant 0 : index
    %c0_6 = arith.constant 0 : index
    %7 = vector.load %arg4[%c0_4, %c0_5, %c0_6] : memref<1x8x32xbf16, #tpu.memory_space<vmem>>, vector<1x8x32xbf16>
    %8 = vector.shape_cast %7 : vector<1x8x32xbf16> to vector<8x32xbf16>
    %9 = vector.shape_cast %6 : vector<8x32xbf16> to vector<1x8x32xbf16>
    tpu.vector_store %arg4[%c0_4, %c0_5, %c0_6], %9 {strides = array<i32>} : memref<1x8x32xbf16, #tpu.memory_space<vmem>>, vector<1x8x32xbf16>,
    %10 = vector.extract_strided_slice %4 {offsets = [0, 32], sizes = [8, 32], strides = [1, 1]} : vector<8x96xf32> to vector<8x32xf32>
    %11 = arith.truncf %10 : vector<8x32xf32> to vector<8x32xbf16>
    %c0_7 = arith.constant 0 : index
    %c0_8 = arith.constant 0 : index
    %c0_9 = arith.constant 0 : index
    %12 = vector.load %arg5[%c0_7, %c0_8, %c0_9] : memref<1x8x32xbf16, #tpu.memory_space<vmem>>, vector<1x8x32xbf16>
    %13 = vector.shape_cast %12 : vector<1x8x32xbf16> to vector<8x32xbf16>
    %14 = vector.shape_cast %11 : vector<8x32xbf16> to vector<1x8x32xbf16>
    tpu.vector_store %arg5[%c0_7, %c0_8, %c0_9], %14 {strides = array<i32>} : memref<1x8x32xbf16, #tpu.memory_space<vmem>>, vector<1x8x32xbf16>,
    %15 = vector.extract_strided_slice %4 {offsets = [0, 64], sizes = [8, 32], strides = [1, 1]} : vector<8x96xf32> to vector<8x32xf32>
    %16 = arith.truncf %15 : vector<8x32xf32> to vector<8x32xbf16>
    %c0_10 = arith.constant 0 : index
    %c0_11 = arith.constant 0 : index
    %c0_12 = arith.constant 0 : index
    %17 = vector.load %arg6[%c0_10, %c0_11, %c0_12] : memref<1x8x32xbf16, #tpu.memory_space<vmem>>, vector<1x8x32xbf16>
    %18 = vector.shape_cast %17 : vector<1x8x32xbf16> to vector<8x32xbf16>
    %19 = vector.shape_cast %16 : vector<8x32xbf16> to vector<1x8x32xbf16>
    tpu.vector_store %arg6[%c0_10, %c0_11, %c0_12], %19 {strides = array<i32>} : memref<1x8x32xbf16, #tpu.memory_space<vmem>>, vector<1x8x32xbf16>,
    return
  }
  func.func @transform_0(%arg0: i32, %arg1: i32) -> (i32, i32, i32) {
    %c0_i32 = arith.constant 0 : i32
    %c0_i32_0 = arith.constant 0 : i32
    return %arg0, %arg1, %c0_i32 : i32, i32, i32
  }
  func.func @transform_1(%arg0: i32, %arg1: i32) -> (i32, i32) {
    %c0_i32 = arith.constant 0 : i32
    %c0_i32_0 = arith.constant 0 : i32
    %c0_i32_1 = arith.constant 0 : i32
    return %c0_i32, %c0_i32_0 : i32, i32
  }
  func.func @transform_2(%arg0: i32, %arg1: i32) -> (i32, i32, i32) {
    %c0_i32 = arith.constant 0 : i32
    %c0_i32_0 = arith.constant 0 : i32
    return %arg0, %arg1, %c0_i32 : i32, i32, i32
  }
  func.func @transform_3(%arg0: i32, %arg1: i32) -> (i32, i32, i32) {
    %c0_i32 = arith.constant 0 : i32
    %c0_i32_0 = arith.constant 0 : i32
    return %arg0, %arg1, %c0_i32 : i32, i32, i32
  }
  func.func @transform_4(%arg0: i32, %arg1: i32) -> (i32, i32, i32) {
    %c0_i32 = arith.constant 0 : i32
    %c0_i32_0 = arith.constant 0 : i32
    return %arg0, %arg1, %c0_i32 : i32, i32, i32
  }
}

</mosaic_0001>

<bundles_post_ra>
// kernel: tpu_custom_call.1
= control target key start
LH: loop header
LB: loop body
LE: loop exit
PB: predicated region body
PF: predicated region fallthrough
CT: control target
= control target key end

     0   :  { %10 = vsyncpa [#allocation3], 0  ;;  %s1216_s0 = inlined_call_operand.hbm [shape: f32[2,8,32], index: 0, kind: input, shape index: {}]   ;;  %s1217_s1 = inlined_call_operand.hbm [shape: bf16[32,96], index: 1, kind: input, shape index: {}]   ;;  %s1218_s2 = inlined_call_operand.hbm [shape: bf16[2,8,32], index: 2, kind: output, shape index: {0}]   ;;  %s1219_s3 = inlined_call_operand.hbm [shape: bf16[2,8,32], index: 3, kind: output, shape index: {1}]   ;;  %s1220_s4 = inlined_call_operand.hbm [shape: bf16[2,8,32], index: 4, kind: output, shape index: {2}]  }
   0x1   :  { %12 = vsyncpa [#allocation3 + $0x1], 0 }
   0x2   :  { %13 = vsyncpa [#allocation6], 0 }
   0x3   :  { %14 = vsyncpa [#allocation4], 0 }
   0x4   :  { %16 = vsyncpa [#allocation4 + $0x1], 0 }
   0x5   :  { %17 = vsyncpa [#allocation9], 0 }
   0x6   :  { %19 = vsyncpa [#allocation9 + $0x1], 0  ;;  %s920_s15 = smov 0   ;;  %s922_s16 = smov 0  }
   0x7   :  { %s924_s17 = smov 0   ;;  %s926_s18 = smov 0  }
   0x8   :  { %s928_s19 = smov 0   ;;  %s930_s20 = smov 0  }
   0x9 LB: > { %s951_s21 = sadd.s32 4294967295, %s882_s20   ;;  %s551_s22 = sadd.s32 4294967294, %s882_s20   ;;  %s882_s20 = sphi %s930_s20, %s25_s20   ;;  %s878_s19 = sphi %s928_s19, %s1242_s19   ;;  %s874_s18 = sphi %s926_s18, %s1241_s18   ;;  %s870_s17 = sphi %s924_s17, %s1240_s17   ;;  %s866_s16 = sphi %s922_s16, %s1239_s16   ;;  %s862_s15 = sphi %s920_s15, %s1238_s15  }
   0xa   : > { %p59_p0 = scmp.ne.s32.totalorder %s866_s16, %s862_s15  ;;  %p1221_p1 = scmp.eq.s32.totalorder %s951_s21, 0 }
   0xb   : > { %p112_p3 = scmp.eq.s32.totalorder %s551_s22, 1  ;;  %p552_p5 = scmp.ge.s32.totalorder %s882_s20, 1 }
   0xc   : > { %p962_p4 = por %p1221_p1, %p59_p0  ;;  %p175_p7 = scmp.lt.s32.totalorder %s882_s20, 3 }
   0xd   : > { %p967_p6 = por %p112_p3, %p59_p0  ;;  %s884_s26 = smov [#allocation5]  }
   0xe   : > { %s1224_s23 = scalar_select %p962_p4, 1, 0 }
   0xf   : > { %s1225_s24 = scalar_select %p967_p6, 1, 0 }
  0x10   : > { %p972_p8 = pnand %p552_p5, %p175_p7  ;;  %s187_s27 = sshll.u32 %s884_s26, 4  ;;  %s188_s27 = int_to_ptr.vmem [resolvable:$true] %s187_s27 }
  0x11   : > { %s37_s29 = sadd.s32 1, %s878_s19  ;;  %s678_s6 = scalar_lea.hbm %s1217_s1, 256 }
  0x12   : > { %s1226_s25 = scalar_select %p972_p8, 1, 0 }
  0x13   : > { %p599_p9 = pneg %p972_p8  ;;  %p679_p12 = scmp.ne.s32.totalorder %s1217_s1, %s678_s6 }
  0x14   : > { %p685_p5 = scmp.lt.u32.totalorder %s678_s6, %s1217_s1 }
  0x15   : > { %p981_p11 = pnand %p599_p9, %p1221_p1 }
  0x17   : > { %p680_p13 = pneg %p981_p11 }
  0x19   : > { %p681_p0 = pnand %p680_p13, %p679_p12 }
  0x1b   : > { %p682_p3 = pneg %p681_p0 }
  0x1d   : > { %p687_p7 = pnand %p685_p5, %p682_p3 }
  0x1f   : > { %690 = shalt.err (!%p687_p7)
}
  0x20   : > { %s691_s11 = scalar_lea.vmem %s188_s27, 256  ;;  %p699_p2 = scmp.lt.s32.totalorder %s188_s27, %s188_s27 }
  0x21   : > { %p692_p9 = scmp.ne.s32.totalorder %s188_s27, %s691_s11  ;;  %p700_p6 = scmp.lt.s32.totalorder %s691_s11, %s691_s11 }
  0x23   : > { %p694_p10 = pnand %p692_p9, %p680_p13  ;;  %p701_p4 = por %p700_p6, %p699_p2 }
  0x25   : > { %p695_p1 = pneg %p694_p10 }
  0x27   : > { %p702_p8 = pnand %p701_p4, %p695_p1 }
  0x29   : > { %705 = shalt.err (!%p702_p8)
}
  0x2a   : > { %s885_s12 = smov 64   ;;  %s886_s13 = smov 4  }
  0x2b   : > { %602 = dma.hbm_to_vmem [thread:$0]  (!%p981_p11), %s1217_s1, 256, %s188_s27, [#allocation6], %s885_s12, %s885_s12, %s886_s13  }
  0x2c   : > { %p39_p1 = scmp.ge.s32.totalorder %s37_s29, 2  ;;  %s46_s30 = sadd.s32 1, %s870_s17 }
  0x2d   : > { %p53_p2 = scmp.ne.s32.totalorder %s870_s17, %s866_s16  ;;  %p54_p4 = scmp.eq.s32.totalorder %s882_s20, 0 }
  0x2e   : > { %s1244_s29 = smov (%p39_p1, %s37_s29), 0  ;;  %p1229_p8 = scmp.eq.s32.totalorder %s951_s21, 1 }
  0x2f   : > { %p1008_p6 = por %p54_p4, %p53_p2  ;;  %s41_s28 = ssub.s32 %s878_s19, %s1244_s29 }
  0x30   : > { %p1014_p10 = por %p1229_p8, %p53_p2  ;;  %p618_p12 = scmp.lt.s32.totalorder %s882_s20, 2 }
  0x31   : > { %p44_p11 = scmp.eq.s32.totalorder %s41_s28, 0  ;;  %s201_s27 = sand.u32 1, %s870_s17  }
  0x32   : > { %s555_s7 = sshll.u32 %s201_s27, 3  ;;  %s556_s9 = sshll.u32 %s878_s19, 7 }
  0x33   : > { %s1023_s8 = scalar_select %p44_p11, %s870_s17, %s46_s30  }
  0x34   : > { %s1029_s12 = scalar_lea.hbm %s1216_s0, %s556_s9  ;;  %s205_s13 = scalar_lea.vmem [#allocation2], %s555_s7 }
  0x35   : > { %s213_s14 = sshll.u32 %s205_s13, 4  ;;  %p1035_p13 = pnand %p618_p12, %p1008_p6  ;;  %s1031_s14 = int_to_ptr.vmem [resolvable:$true] %s213_s14 }
  0x36   : > { %s202_s30 = scalar_lea.sflag [#allocation3], %s201_s27  ;;  %s706_s28 = scalar_lea.hbm %s1029_s12, 128 }
  0x37   : > { %p707_p0 = scmp.ne.s32.totalorder %s1029_s12, %s706_s28  ;;  %p708_p3 = pneg %p1035_p13 }
  0x38   : > { %s711_s10 = scalar_lea.hbm %s1216_s0, 256  ;;  %p712_p9 = scmp.lt.u32.totalorder %s1029_s12, %s1216_s0 }
  0x39   : > { %p709_p5 = pnand %p708_p3, %p707_p0  ;;  %p713_p1 = scmp.lt.u32.totalorder %s711_s10, %s706_s28 }
  0x3a   : > { %p715_p4 = scmp.lt.u32.totalorder %s706_s28, %s1029_s12 }
  0x3b   : > { %p710_p7 = pneg %p709_p5  ;;  %p714_p2 = por %p713_p1, %p712_p9 }
  0x3d   : > { %p716_p6 = por %p715_p4, %p714_p2 }
  0x3f   : > { %p717_p8 = pnand %p716_p6, %p710_p7 }
  0x41   : > { %720 = shalt.err (!%p717_p8)
}
  0x42   : > { %s721_s27 = scalar_lea.vmem %s1031_s14, 128  ;;  %s887_s13 = smov [#allocation2]  }
  0x43   : > { %p722_p12 = scmp.ne.s32.totalorder %s1031_s14, %s721_s27  ;;  %s726_s7 = sshll.u32 %s887_s13, 4  ;;  %s727_s7 = int_to_ptr.vmem [resolvable:$false] %s726_s7 }
  0x44   : > { %s728_s9 = scalar_lea.vmem %s727_s7, 256  ;;  %p729_p5 = scmp.lt.s32.totalorder %s1031_s14, %s727_s7 }
  0x45   : > { %p724_p11 = pnand %p722_p12, %p708_p3  ;;  %p730_p9 = scmp.lt.s32.totalorder %s728_s9, %s721_s27 }
  0x47   : > { %p725_p0 = pneg %p724_p11  ;;  %p731_p1 = por %p730_p9, %p729_p5 }
  0x49   : > { %p732_p2 = pnand %p731_p1, %p725_p0 }
  0x4b   : > { %735 = shalt.err (!%p732_p2)
}
  0x4c   : > { %606 = dma.hbm_to_vmem [thread:$0]  (!%p1035_p13), %s1029_s12, 128, %s1031_s14, %s202_s30  }
  0x4d   : > { %p1232_p7 = scmp.ne.s32.totalorder %s1226_s25, 0 }
  0x4e   : > { %s1067_s28 = sand.u32 (!%p1232_p7), 1, %s866_s16   ;;  %p1233_p3 = scmp.ne.s32.totalorder (!%p1232_p7), %s1224_s23, 0 }
  0x4f   : > { %222 = sbr.rel (%p1232_p7) target bundleno = 465 (0x1d1), region = 28  ;;  %s558_s10 = sshll.u32 (!%p1232_p7), %s1067_s28, 3 }
  0x50   : > { %s225_s5 = scalar_lea.sflag (!%p1232_p7), [#allocation3], %s1067_s28  ;;  %s228_s11 = scalar_lea.vmem (!%p1232_p7), [#allocation2], %s558_s10 }
  0x56   : > { %845 = dma.done.wait (%p1233_p3), %s225_s5, 128  }
  0x57   : > { %847 = vsyncadd (%p1233_p3), %s225_s5, 4294967168  ;;  %p1234_p4 = scmp.eq.s32.totalorder %s951_s21, 0 }
  0x59   : > { %849 = dma.done.wait (%p1234_p4), [#allocation6], 256   ;;  %p1235_p13 = pmov %p1234_p4 }
  0x5a   : > { %v888_v0 = vmov 0.0   ;;  %vm889_vm0 = vmmov 0   ;;  %v676_v1 = vld [vmem:[#allocation5] sm:$0xff]   ;;  %v677_v2 = vld [vmem:[#allocation5 + $0x8] sm:$0xff]   ;;  %v268_v3 = vld [vmem:[%s228_s11] sm:$0xff]  ;;  %vm286_vm1 = vcmask 261120  }
  0x5b   : > { %851 = vsyncadd (%p1235_p13), [#allocation6], 4294967040  ;;  %579 = vmatprep.subr.bf16.mxu0 %v888_v0  ;;  %583 = vmatprep.mubr.msk.bf16.mxu0 %vm889_vm0, %v888_v0  ;;  %v269_v4 = vpack.c.bf16 %v268_v3, %v268_v3  ;;  %s1080_s23 = sshll.u32 %s1067_s28, 2  ;;  %s1083_s25 = sshll.u32 %s874_s18, 6  ;;  %vm331_vm2 = vcmask 257024  }
  0x5c   : > { %580 = vmatpush3.bf16.msra.mxu0 %v676_v1  ;;  %s252_s12 = scalar_lea.vmem [#allocation7], %s1080_s23  ;;  %s1090_s27 = scalar_lea.hbm %s1218_s2, %s1083_s25 }
  0x5d   : > { %581 = vmatprep.subr.bf16.mxu0 %v888_v0  ;;  %s369_s14 = sshll.u32 %s252_s12, 4  ;;  %s890_s18 = smov 96   ;;  %s1092_s14 = int_to_ptr.vmem [resolvable:$true] %s369_s14 }
  0x5e   : > { %s345_s13 = scalar_lea.sflag [#allocation4], %s1067_s28  ;;  %s736_s7 = scalar_lea.vmem %s1092_s14, 64 }
  0x5f   : > { %p737_p6 = scmp.ne.s32.totalorder %s1092_s14, %s736_s7  ;;  %s891_s9 = smov [#allocation7]  }
  0x60   : > { %582 = vmatpush3.bf16.msra.mxu0 %v677_v2  ;;  %s740_s10 = sshll.u32 %s891_s9, 4  ;;  %s741_s10 = int_to_ptr.vmem [resolvable:$false] %s740_s10 }
  0x61   : > { %p738_p8 = pnand %p737_p6, %p1014_p10  ;;  %s742_s5 = scalar_lea.vmem %s741_s10, 128 }
  0x62   : > { %p743_p11 = scmp.lt.s32.totalorder %s1092_s14, %s741_s10  ;;  %p744_p0 = scmp.lt.s32.totalorder %s742_s5, %s736_s7 }
  0x63   : > { %584 = vmatmul.mubr.msk.bf16.vlgmr.msra.gmra.mrb[0].mxu0 %vm286_vm1, %v269_v4  ;;  %p739_p12 = pneg %p738_p8 }
  0x64   : > { %p745_p5 = por %p744_p0, %p743_p11 }
  0x66   : > { %p746_p9 = pnand %p745_p5, %p739_p12 }
 0x136   : > { %v324_v5 = vpop.f32.mrb[0].mxu0 }
 0x137   : > { %v330_v6 = vpack.c.bf16 %v324_v5, %v324_v5  ;;  %v585_v7 = vpop.f32.mrb[1].mxu0 }
 0x138   : > { %v327_v8 = vpop.f32.mrb[2].mxu0 }
 0x139   : > { %336 = vrot.lane.b32.xlu0 %v330_v6, %s890_s18  ;;  %v586_v9 = vpop.f32.mrb[3].mxu0  ;;  %332 = vst.msk [vmem:[%s252_s12] sm:$0xf] %vm331_vm2, %v330_v6 }
 0x13a   : > { %749 = shalt.err (!%p746_p9)
}
 0x13b   : > { %s750_s28 = scalar_lea.hbm %s1090_s27, 64  ;;  %s754_s26 = scalar_lea.hbm %s1218_s2, 128 }
 0x13c   : > { %p751_p1 = scmp.ne.s32.totalorder %s1090_s27, %s750_s28  ;;  %p755_p3 = scmp.lt.u32.totalorder %s1090_s27, %s1218_s2 }
 0x13d   : > { %p756_p4 = scmp.lt.u32.totalorder %s754_s26, %s750_s28  ;;  %p758_p6 = scmp.lt.u32.totalorder %s750_s28, %s1090_s27 }
 0x13e   : > { %p752_p2 = pnand %p751_p1, %p1014_p10 }
 0x13f   : > { %p757_p13 = por %p756_p4, %p755_p3 }
 0x140   : > { %p753_p7 = pneg %p752_p2 }
 0x141   : > { %p759_p8 = por %p758_p6, %p757_p13 }
 0x143   : > { %p760_p12 = pnand %p759_p8, %p753_p7 }
 0x145   : > { %763 = shalt.err (!%p760_p12)
}
 0x146   : > { %593 = dma.vmem_to_hbm [thread:$0]  (%p1014_p10), %s1092_s14, 64, %s1090_s27, %s345_s13  }
 0x147   : > { %s892_s7 = smov 64   ;;  %s349_s9 = sand.u32 1, %s951_s21  }
 0x148   : > { %340 = vrot.lane.b32.xlu0 %v330_v6, %s892_s7  ;;  %s259_s10 = scalar_lea.vmem [#allocation8], %s1080_s23  ;;  %s1123_s12 = scalar_lea.hbm %s1219_s3, %s1083_s25 }
 0x149   : > { %s383_s5 = sshll.u32 %s259_s10, 4  ;;  %s266_s26 = scalar_lea.vmem [#allocation10], %s1080_s23  ;;  %s1125_s5 = int_to_ptr.vmem [resolvable:$true] %s383_s5 }
 0x14a   : > { %s1130_s30 = sshll.u32 %s266_s26, 4  ;;  %s1133_s21 = scalar_lea.sflag [#allocation9], %s349_s9  ;;  %s1164_s30 = int_to_ptr.vmem [resolvable:$true] %s1130_s30 }
 0x14b   : > { %s764_s14 = scalar_lea.vmem %s1125_s5, 64  ;;  %s893_s27 = smov [#allocation8]  }
 0x14c   : > { %p765_p11 = scmp.ne.s32.totalorder %s1125_s5, %s764_s14  ;;  %s768_s13 = sshll.u32 %s893_s27, 4  ;;  %s769_s13 = int_to_ptr.vmem [resolvable:$false] %s768_s13 }
 0x14d   : > { %s770_s18 = scalar_lea.vmem %s769_s13, 128  ;;  %p771_p9 = scmp.lt.s32.totalorder %s1125_s5, %s769_s13 }
 0x14e   : > { %p766_p0 = pnand %p765_p11, %p1014_p10  ;;  %p772_p1 = scmp.lt.s32.totalorder %s770_s18, %s764_s14 }
 0x150   : > { %p767_p5 = pneg %p766_p0  ;;  %p773_p2 = por %p772_p1, %p771_p9 }
 0x152   : > { %p774_p7 = pnand %p773_p2, %p767_p5 }
 0x1ab   : > { %v337_v10 = vpop.permute.xlu0 %336 }
 0x1ac   : > { %339 = vst.msk [vmem:[%s259_s10] sm:$0xf] %vm331_vm2, %v337_v10 }
 0x1ad   : > { %777 = shalt.err (!%p774_p7)
}
 0x1ae   : > { %s778_s7 = scalar_lea.hbm %s1123_s12, 64  ;;  %s782_s28 = scalar_lea.hbm %s1219_s3, 128 }
 0x1af   : > { %p779_p3 = scmp.ne.s32.totalorder %s1123_s12, %s778_s7  ;;  %p783_p6 = scmp.lt.u32.totalorder %s1123_s12, %s1219_s3 }
 0x1b0   : > { %p784_p8 = scmp.lt.u32.totalorder %s782_s28, %s778_s7  ;;  %p786_p11 = scmp.lt.u32.totalorder %s778_s7, %s1123_s12 }
 0x1b1   : > { %p780_p4 = pnand %p779_p3, %p1014_p10 }
 0x1b2   : > { %p785_p12 = por %p784_p8, %p783_p6 }
 0x1b3   : > { %p781_p13 = pneg %p780_p4 }
 0x1b4   : > { %p787_p0 = por %p786_p11, %p785_p12 }
 0x1b6   : > { %p788_p5 = pnand %p787_p0, %p781_p13 }
 0x1b8   : > { %791 = shalt.err (!%p788_p5)
}
 0x1b9   : > { %594 = dma.vmem_to_hbm [thread:$0]  (%p1014_p10), %s1125_s5, 64, %s1123_s12, %s1133_s21  }
 0x1ba   : > { %s1161_s18 = scalar_lea.hbm %s1220_s4, %s1083_s25  ;;  %v341_v11 = vpop.permute.xlu0 %340  ;;  %s792_s7 = scalar_lea.vmem %s1164_s30, 64 }
 0x1bb   : > { %343 = vst.msk [vmem:[%s266_s26] sm:$0xf] %vm331_vm2, %v341_v11  ;;  %p793_p9 = scmp.ne.s32.totalorder %s1164_s30, %s792_s7  ;;  %s894_s5 = smov [#allocation10]  }
 0x1bc   : > { %s796_s12 = sshll.u32 %s894_s5, 4  ;;  %s797_s12 = int_to_ptr.vmem [resolvable:$false] %s796_s12 }
 0x1bd   : > { %p794_p1 = pnand %p793_p9, %p1014_p10  ;;  %s798_s9 = scalar_lea.vmem %s797_s12, 128 }
 0x1be   : > { %p799_p7 = scmp.lt.s32.totalorder %s1164_s30, %s797_s12  ;;  %p800_p3 = scmp.lt.s32.totalorder %s798_s9, %s792_s7 }
 0x1bf   : > { %p795_p2 = pneg %p794_p1 }
 0x1c0   : > { %p801_p4 = por %p800_p3, %p799_p7 }
 0x1c2   : > { %p802_p13 = pnand %p801_p4, %p795_p2 }
 0x1c4   : > { %805 = shalt.err (!%p802_p13)
}
 0x1c5   : > { %s806_s23 = scalar_lea.hbm %s1161_s18, 64  ;;  %s810_s10 = scalar_lea.hbm %s1220_s4, 128 }
 0x1c6   : > { %p807_p6 = scmp.ne.s32.totalorder %s1161_s18, %s806_s23  ;;  %p811_p11 = scmp.lt.u32.totalorder %s1161_s18, %s1220_s4 }
 0x1c7   : > { %p812_p0 = scmp.lt.u32.totalorder %s810_s10, %s806_s23  ;;  %p814_p9 = scmp.lt.u32.totalorder %s806_s23, %s1161_s18 }
 0x1c8   : > { %p808_p8 = pnand %p807_p6, %p1014_p10 }
 0x1c9   : > { %p813_p5 = por %p812_p0, %p811_p11 }
 0x1ca   : > { %p809_p12 = pneg %p808_p8 }
 0x1cb   : > { %p815_p1 = por %p814_p9, %p813_p5 }
 0x1cd   : > { %p816_p2 = pnand %p815_p1, %p809_p12 }
 0x1cf   : > { %819 = shalt.err (!%p816_p2)
}
 0x1d0   : > { %595 = dma.vmem_to_hbm [thread:$0]  (%p1014_p10), %s1164_s30, 64, %s1161_s18, %s1133_s21  }
 0x1d1 PF: > { %s409_s27 = sand.u32 1, %s862_s15   ;;  %p1236_p7 = scmp.ne.s32.totalorder %s1225_s24, 0 }
 0x1d2   : > { %p1237_p3 = scmp.ge.s32.totalorder %s882_s20, 2  ;;  %s410_s14 = scalar_lea.sflag [#allocation4], %s409_s27 }
 0x1d4   : > { %p608_p4 = pnand %p1237_p3, %p1236_p7 }
 0x1d6   : > { %853 = dma.done.wait (!%p608_p4), %s410_s14, 64  }
 0x1d7   : > { %855 = vsyncadd (!%p608_p4), %s410_s14, 4294967232  ;;  %s418_s13 = sand.u32 1, %s551_s22  }
 0x1d8   : > { %s419_s7 = scalar_lea.sflag [#allocation9], %s418_s13 }
 0x1d9   : > { %857 = dma.done.wait (!%p608_p4), %s419_s7, 128  }
 0x1da   : > { %859 = vsyncadd (!%p608_p4), %s419_s7, 4294967168  ;;  %s25_s20 = sadd.s32 1, %s882_s20   ;;  %s1238_s15 = smov %s866_s16 }
 0x1db   : > { %p22_p10 = scmp.ge.s32.totalorder %s25_s20, 4   ;;  %s1239_s16 = smov %s870_s17 }
 0x1dc   : > { %s1240_s17 = smov %s1023_s8  ;;  %s1241_s18 = smov %s878_s19 }
 0x1dd   : > { %s1242_s19 = smov %s1244_s29  ;;  %24 = sbr.rel (!%p22_p10) target bundleno = 9 (0x9), region = 109 }
 0x1e4   :  { %433 = vsyncpa [#allocation3], 1 }
 0x1e5   :  { %435 = vsyncpa [#allocation3 + $0x1], 1 }
 0x1e6   :  { %436 = vsyncpa [#allocation6], 1 }
 0x1e7   :  { %437 = vsyncpa [#allocation4], 1 }
 0x1e8   :  { %439 = vsyncpa [#allocation4 + $0x1], 1 }
 0x1e9   :  { %440 = vsyncpa [#allocation9], 1 }
 0x1ea   :  { %442 = vsyncpa [#allocation9 + $0x1], 1 }

</bundles_post_ra>
